<compile_context>
chip_gen: v5e
topology: v5e:2x2
jax: 0.10.0
libtpu: 0.0.40
codegen_flags: <defaults>
</compile_context>

<pallas_src>
import functools

import jax
import jax.numpy as jnp
from jax import lax
from jax.experimental import pallas as pl
from jax.experimental.pallas import tpu as pltpu

EPS = 1e-12  # torch F.normalize eps


def _round_up(a, b):
    return (a + b - 1) // b * b


def _arc_margin_kernel(x_ref, w_ref, o_ref, *, k, mxu_dtype):
    # x_ref: (TB, D) f32 raw input rows
    # w_ref: (k, TN, D) pre-normalized weights in mxu_dtype
    # o_ref: (TB, TN)
    x = x_ref[...]
    inv = lax.rsqrt(jnp.maximum(jnp.sum(x * x, axis=-1, keepdims=True), EPS * EPS))
    xn = (x * inv).astype(mxu_dtype)

    acc = None
    for j in range(k):  # small static k -> unrolled at trace time
        # cosine logits for sub-center j: (TB, D) x (TN, D) contracted on D
        logits_j = lax.dot_general(
            xn, w_ref[j], (((1,), (1,)), ((), ())),
            preferred_element_type=jnp.float32,
        )
        acc = logits_j if acc is None else jnp.maximum(acc, logits_j)

    o_ref[...] = acc.astype(o_ref.dtype)


def arc_margin_subcenter(x, weight, *, out_features, k, block_b=256, block_n=256,
                         mxu_dtype=jnp.bfloat16):
    """x: (B, in_features); weight: (out_features*k, in_features)."""
    B, D = x.shape
    assert weight.shape == (out_features * k, D)

    # One-shot weight normalization outside the kernel (f32 math).
    w32 = weight.astype(jnp.float32)
    w_inv = lax.rsqrt(jnp.maximum(jnp.sum(w32 * w32, axis=-1, keepdims=True),
                                  EPS * EPS))
    wn = w32 * w_inv
    # Row i of `weight` is class (i // k), sub-center (i % k) -> (k, OUT, D),
    # matching torch's logits.view(B, out_features, k).
    wn = wn.reshape(out_features, k, D).transpose(1, 0, 2)

    # Tile sizes: clamp to the (padded) problem so small test shapes still work.
    tb = min(block_b, _round_up(B, 8))          # batch tile (MXU height)
    tn = min(block_n, _round_up(out_features, 128))  # class tile (lane-dense output)
    B_pad = _round_up(B, tb)
    N_pad = _round_up(out_features, tn)

    if B_pad != B:
        x = jnp.pad(x, ((0, B_pad - B), (0, 0)))        # zero rows -> zero logits
    if N_pad != out_features:
        wn = jnp.pad(wn, ((0, 0), (0, N_pad - out_features), (0, 0)))
    wn = wn.astype(mxu_dtype)                           # halve weight-stream bytes

    grid = (B_pad // tb, N_pad // tn)

    # Explicit VMEM budget (double-buffered tiles + headroom), v7x-safe cap.
    x_bytes = tb * D * x.dtype.itemsize
    w_bytes = k * tn * D * jnp.dtype(mxu_dtype).itemsize
    o_bytes = tb * tn * x.dtype.itemsize
    vmem_limit = int(min(max(2 * (x_bytes + w_bytes + o_bytes) + (4 << 20),
                             16 << 20), 64 << 20))

    out = pl.pallas_call(
        functools.partial(_arc_margin_kernel, k=k, mxu_dtype=mxu_dtype),
        out_shape=jax.ShapeDtypeStruct((B_pad, N_pad), x.dtype),
        grid=grid,
        in_specs=[
            pl.BlockSpec((tb, D), lambda i, j: (i, 0)),
            pl.BlockSpec((k, tn, D), lambda i, j: (0, j, 0)),
        ],
        out_specs=pl.BlockSpec((tb, tn), lambda i, j: (i, j)),
        compiler_params=pltpu.CompilerParams(
            dimension_semantics=("parallel", "parallel"),
            vmem_limit_bytes=vmem_limit,
        ),
    )(x, wn)
    return out[:B, :out_features]


def _reference(x, weight, out_features, k):
    xn = x / jnp.maximum(jnp.linalg.norm(x, axis=1, keepdims=True), EPS)
    wn = weight / jnp.maximum(jnp.linalg.norm(weight, axis=1, keepdims=True), EPS)
    logits = xn @ wn.T                               # (B, out_features * k)
    logits = logits.reshape(-1, out_features, k)
    return jnp.max(logits, axis=2)


if __name__ == "__main__":
    in_features = 32
    out_features = 16
    k = 3
    batch = 8

    key = jax.random.PRNGKey(0)
    kx, kw = jax.random.split(key)
    x = jax.random.normal(kx, (batch, in_features), dtype=jnp.float32)
    # nn.init.normal_(weight, std=0.01)
    weight = 0.01 * jax.random.normal(
        kw, (out_features * k, in_features), dtype=jnp.float32
    )

    ref = _reference(x, weight, out_features, k)

    # Default (bf16 MXU operands, f32 accumulation) — relaxed tolerance.
    out = arc_margin_subcenter(x, weight, out_features=out_features, k=k)
    out = jax.block_until_ready(out)
    assert out.shape == (batch, out_features)
    assert jnp.allclose(out, ref, atol=2e-2, rtol=0.0), "bf16 path mismatch"

    # Full-precision MXU path — tight tolerance sanity check of semantics.
    out_f32 = arc_margin_subcenter(
        x, weight, out_features=out_features, k=k, mxu_dtype=jnp.float32
    )
    out_f32 = jax.block_until_ready(out_f32)
    assert jnp.allclose(out_f32, ref, atol=1e-5, rtol=1e-5), "f32 path mismatch"

    print("KERNEL_OK")
</pallas_src>

<mosaic_0001>
module attributes {stable_mosaic.version = 11 : i64} {
  func.func @_arc_margin_kernel(%arg0: i32, %arg1: i32, %arg2: memref<8x32xf32, #tpu.memory_space<vmem>>, %arg3: memref<3x128x32xbf16, #tpu.memory_space<vmem>>, %arg4: memref<8x128xf32, #tpu.memory_space<vmem>>) attributes {dimension_semantics = [#tpu.dimension_semantics<parallel>, #tpu.dimension_semantics<parallel>], iteration_bounds = array<i64: 1, 1>, scalar_prefetch = 0 : i64, scratch_operands = 0 : i64, tpu.core_type = #tpu.core_type<tc>, window_params = [{transform_indices = @transform_0, window_bounds = array<i64: 8, 32>}, {transform_indices = @transform_1, window_bounds = array<i64: 3, 128, 32>}, {transform_indices = @transform_2, window_bounds = array<i64: 8, 128>}]} {
    %c0 = arith.constant 0 : index
    %c0_0 = arith.constant 0 : index
    %0 = vector.load %arg2[%c0, %c0_0] : memref<8x32xf32, #tpu.memory_space<vmem>>, vector<8x32xf32>
    %1 = arith.mulf %0, %0 : vector<8x32xf32>
    %cst = arith.constant dense<0.000000e+00> : vector<8xf32>
    %2 = vector.multi_reduction <add>, %1, %cst [1] : vector<8x32xf32> to vector<8xf32>
    %3 = vector.shape_cast %2 : vector<8xf32> to vector<8x1xf32>
    %cst_1 = arith.constant 1.000000e-24 : f32
    %4 = vector.broadcast %cst_1 : f32 to vector<8x1xf32>
    %5 = arith.maximumf %3, %4 : vector<8x1xf32>
    %6 = math.rsqrt %5 : vector<8x1xf32>
    %7 = vector.broadcast %6 : vector<8x1xf32> to vector<8x32xf32>
    %8 = arith.mulf %0, %7 : vector<8x32xf32>
    %9 = arith.truncf %8 : vector<8x32xf32> to vector<8x32xbf16>
    %c0_2 = arith.constant 0 : index
    %c0_3 = arith.constant 0 : index
    %c0_4 = arith.constant 0 : index
    %10 = vector.load %arg3[%c0_2, %c0_3, %c0_4] : memref<3x128x32xbf16, #tpu.memory_space<vmem>>, vector<1x128x32xbf16>
    %11 = vector.shape_cast %10 : vector<1x128x32xbf16> to vector<128x32xbf16>
    %cst_5 = arith.constant dense<0.000000e+00> : vector<8x128xf32>
    %12 = tpu.matmul %9, %11, %cst_5 {dimension_numbers = #tpu.dot_dimension_numbers<[1], [1], [0], [0], [0, 0, 1, 0], [], []>} : vector<8x32xbf16>, vector<128x32xbf16>, vector<8x128xf32> -> vector<8x128xf32>
    %c1 = arith.constant 1 : index
    %c0_6 = arith.constant 0 : index
    %c0_7 = arith.constant 0 : index
    %13 = vector.load %arg3[%c1, %c0_6, %c0_7] : memref<3x128x32xbf16, #tpu.memory_space<vmem>>, vector<1x128x32xbf16>
    %14 = vector.shape_cast %13 : vector<1x128x32xbf16> to vector<128x32xbf16>
    %cst_8 = arith.constant dense<0.000000e+00> : vector<8x128xf32>
    %15 = tpu.matmul %9, %14, %cst_8 {dimension_numbers = #tpu.dot_dimension_numbers<[1], [1], [0], [0], [0, 0, 1, 0], [], []>} : vector<8x32xbf16>, vector<128x32xbf16>, vector<8x128xf32> -> vector<8x128xf32>
    %16 = arith.maximumf %12, %15 : vector<8x128xf32>
    %c2 = arith.constant 2 : index
    %c0_9 = arith.constant 0 : index
    %c0_10 = arith.constant 0 : index
    %17 = vector.load %arg3[%c2, %c0_9, %c0_10] : memref<3x128x32xbf16, #tpu.memory_space<vmem>>, vector<1x128x32xbf16>
    %18 = vector.shape_cast %17 : vector<1x128x32xbf16> to vector<128x32xbf16>
    %cst_11 = arith.constant dense<0.000000e+00> : vector<8x128xf32>
    %19 = tpu.matmul %9, %18, %cst_11 {dimension_numbers = #tpu.dot_dimension_numbers<[1], [1], [0], [0], [0, 0, 1, 0], [], []>} : vector<8x32xbf16>, vector<128x32xbf16>, vector<8x128xf32> -> vector<8x128xf32>
    %20 = arith.maximumf %16, %19 : vector<8x128xf32>
    %c0_12 = arith.constant 0 : index
    %c0_13 = arith.constant 0 : index
    %21 = vector.load %arg4[%c0_12, %c0_13] : memref<8x128xf32, #tpu.memory_space<vmem>>, vector<8x128xf32>
    tpu.vector_store %arg4[%c0_12, %c0_13], %20 {strides = array<i32>} : memref<8x128xf32, #tpu.memory_space<vmem>>, vector<8x128xf32>,
    return
  }
  func.func @transform_0(%arg0: i32, %arg1: i32) -> (i32, i32) {
    %c0_i32 = arith.constant 0 : i32
    %c0_i32_0 = arith.constant 0 : i32
    return %arg0, %c0_i32 : i32, i32
  }
  func.func @transform_1(%arg0: i32, %arg1: i32) -> (i32, i32, i32) {
    %c0_i32 = arith.constant 0 : i32
    %c0_i32_0 = arith.constant 0 : i32
    %c0_i32_1 = arith.constant 0 : i32
    return %c0_i32, %arg1, %c0_i32_0 : i32, i32, i32
  }
  func.func @transform_2(%arg0: i32, %arg1: i32) -> (i32, i32) {
    %c0_i32 = arith.constant 0 : i32
    return %arg0, %arg1 : i32, i32
  }
}

</mosaic_0001>

<bundles_post_ra>
// kernel: tpu_custom_call.1
= control target key start
LH: loop header
LB: loop body
LE: loop exit
PB: predicated region body
PF: predicated region fallthrough
CT: control target
= control target key end

     0   :  { %vm14_vm0 = vcmask 261120   ;;  %s645_s0 = inlined_call_operand.vmem [shape: f32[8,32], index: 0, kind: input, shape index: {}]   ;;  %s646_s1 = inlined_call_operand.vmem [shape: bf16[3,128,32], index: 1, kind: input, shape index: {}]   ;;  %s647_s2 = inlined_call_operand.hbm [shape: f32[8,128], index: 2, kind: output, shape index: {}]  }
   0x1   :  { %v537_v0 = vld [vmem:[%s645_s0] sm:$0xff]  ;;  %v472_v1 = vld [vmem:[%s646_s1 + $0x38] sm:$0xff]  ;;  %v471_v9 = vld [vmem:[%s646_s1 + $0x30] sm:$0xff] }
   0x2   :  { %v480_v2 = vld [vmem:[%s646_s1 + $0x78] sm:$0xff]  ;;  %v13_v3 = vmul.f32 %v537_v0, %v537_v0  ;;  %v112_v5 = vsel %vm14_vm0, %v472_v1, 0  ;;  %v479_v10 = vld [vmem:[%s646_s1 + $0x70] sm:$0xff] }
   0x3   :  { %v488_v4 = vld [vmem:[%s646_s1 + $0xb8] sm:$0xff]  ;;  %v206_v6 = vsel %vm14_vm0, %v480_v2, 0  ;;  %114 = vmatpush.bf16.xpose.msra.mxu0 %v112_v5  ;;  %v487_v11 = vld [vmem:[%s646_s1 + $0xb0] sm:$0xff] }
   0x4   :  { %v15_v7 = vsel %vm14_vm0, %v13_v3, 0.0  ;;  %208 = vmatpush.bf16.xpose.msra.mxu1 %v206_v6  ;;  %v301_v8 = vsel %vm14_vm0, %v488_v4, 0 }
   0x5   :  { %16 = vadd.xlane.f32.xlu0 %v15_v7  ;;  %303 = vmatpush.bf16.xpose.msra.mxu2 %v301_v8 }
   0x6   :  { %7 = vsyncpa [#allocation3], 0  ;;  %v109_v12 = vsel %vm14_vm0, %v471_v9, 0  ;;  %v203_v13 = vsel %vm14_vm0, %v479_v10, 0  ;;  %v298_v14 = vsel %vm14_vm0, %v487_v11, 0  ;;  %v470_v15 = vld [vmem:[%s646_s1 + $0x28] sm:$0xff] }
   0x7   :  { %v478_v16 = vld [vmem:[%s646_s1 + $0x68] sm:$0xff]  ;;  %v106_v18 = vsel %vm14_vm0, %v470_v15, 0  ;;  %v469_v21 = vld [vmem:[%s646_s1 + $0x20] sm:$0xff]  ;;  %v468_v27 = vld [vmem:[%s646_s1 + $0x18] sm:$0xff]  ;;  %s325_s4 = sshll.u32 %s647_s2, 4  ;;  %s326_s4 = int_to_ptr.hbm [resolvable:$true] %s325_s4 }
   0x8   :  { %v486_v17 = vld [vmem:[%s646_s1 + $0xa8] sm:$0xff]  ;;  %v200_v19 = vsel %vm14_vm0, %v478_v16, 0  ;;  %v477_v22 = vld [vmem:[%s646_s1 + $0x60] sm:$0xff]  ;;  %v103_v24 = vsel %vm14_vm0, %v469_v21, 0  ;;  %v476_v28 = vld [vmem:[%s646_s1 + $0x58] sm:$0xff]  ;;  %v100_v30 = vsel %vm14_vm0, %v468_v27, 0 }
   0x9   :  { %v295_v20 = vsel %vm14_vm0, %v486_v17, 0  ;;  %v485_v23 = vld [vmem:[%s646_s1 + $0xa0] sm:$0xff]  ;;  %v197_v25 = vsel %vm14_vm0, %v477_v22, 0  ;;  %v484_v29 = vld [vmem:[%s646_s1 + $0x98] sm:$0xff]  ;;  %v194_v31 = vsel %vm14_vm0, %v476_v28, 0  ;;  %v467_v33 = vld [vmem:[%s646_s1 + $0x10] sm:$0xff] }
   0xa   :  { %v292_v26 = vsel %vm14_vm0, %v485_v23, 0  ;;  %v289_v32 = vsel %vm14_vm0, %v484_v29, 0  ;;  %v475_v34 = vld [vmem:[%s646_s1 + $0x50] sm:$0xff]  ;;  %v97_v36 = vsel %vm14_vm0, %v467_v33, 0  ;;  %v466_v39 = vld [vmem:[%s646_s1 + $0x8] sm:$0xff]  ;;  %v465_v45 = vld [vmem:[%s646_s1] sm:$0xff] }
   0xb   :  { %115 = vmatpush.bf16.xpose.msra.mxu0 %v109_v12  ;;  %v483_v35 = vld [vmem:[%s646_s1 + $0x90] sm:$0xff]  ;;  %v191_v37 = vsel %vm14_vm0, %v475_v34, 0  ;;  %v474_v40 = vld [vmem:[%s646_s1 + $0x48] sm:$0xff]  ;;  %v94_v42 = vsel %vm14_vm0, %v466_v39, 0  ;;  %v473_v46 = vld [vmem:[%s646_s1 + $0x40] sm:$0xff]  ;;  %v91_v48 = vsel %vm14_vm0, %v465_v45, 0 }
   0xc   :  { %209 = vmatpush.bf16.xpose.msra.mxu1 %v203_v13  ;;  %v286_v38 = vsel %vm14_vm0, %v483_v35, 0  ;;  %v482_v41 = vld [vmem:[%s646_s1 + $0x88] sm:$0xff]  ;;  %v188_v43 = vsel %vm14_vm0, %v474_v40, 0  ;;  %v481_v47 = vld [vmem:[%s646_s1 + $0x80] sm:$0xff]  ;;  %v185_v49 = vsel %vm14_vm0, %v473_v46, 0  ;;  %s518_s1 = smov [#allocation2]  }
   0xd   :  { %304 = vmatpush.bf16.xpose.msra.mxu2 %v298_v14  ;;  %v283_v44 = vsel %vm14_vm0, %v482_v41, 0  ;;  %v280_v50 = vsel %vm14_vm0, %v481_v47, 0  ;;  %s323_s29 = sshll.u32 %s518_s1, 4  ;;  %s324_s29 = int_to_ptr.vmem [resolvable:$true] %s323_s29 }
  0x13   :  { %116 = vmatpush.bf16.xpose.msra.mxu0 %v106_v18 }
  0x14   :  { %210 = vmatpush.bf16.xpose.msra.mxu1 %v200_v19 }
  0x15   :  { %305 = vmatpush.bf16.xpose.msra.mxu2 %v295_v20 }
  0x1b   :  { %117 = vmatpush.bf16.xpose.msra.mxu0 %v103_v24 }
  0x1c   :  { %211 = vmatpush.bf16.xpose.msra.mxu1 %v197_v25 }
  0x1d   :  { %306 = vmatpush.bf16.xpose.msra.mxu2 %v292_v26 }
  0x23   :  { %118 = vmatpush.bf16.xpose.msra.mxu0 %v100_v30 }
  0x24   :  { %212 = vmatpush.bf16.xpose.msra.mxu1 %v194_v31 }
  0x25   :  { %307 = vmatpush.bf16.xpose.msra.mxu2 %v289_v32 }
  0x2b   :  { %119 = vmatpush.bf16.xpose.msra.mxu0 %v97_v36 }
  0x2c   :  { %213 = vmatpush.bf16.xpose.msra.mxu1 %v191_v37 }
  0x2d   :  { %308 = vmatpush.bf16.xpose.msra.mxu2 %v286_v38 }
  0x33   :  { %120 = vmatpush.bf16.xpose.msra.mxu0 %v94_v42 }
  0x34   :  { %214 = vmatpush.bf16.xpose.msra.mxu1 %v188_v43 }
  0x35   :  { %309 = vmatpush.bf16.xpose.msra.mxu2 %v283_v44 }
  0x3b   :  { %121 = vmatpush.bf16.xpose.msra.mxu0 %v91_v48 }
  0x3c   :  { %215 = vmatpush.bf16.xpose.msra.mxu1 %v185_v49 }
  0x3d   :  { %310 = vmatpush.bf16.xpose.msra.mxu2 %v280_v50 }
  0x78   :  { %v17_v51 = vpop.xlane.xlu0 %16 }
  0x79   :  { %v18_v52 = vmax.f32 %v17_v51, 1e-24 }
  0x7b   :  { %490 = vrsqrt.f32 %v18_v52  ;;  %vm25_vm2 = vweird.f32 %v18_v52 }
  0x81   :  { %v491_v53 = vpop.eup %490 }
  0x82   :  { %v20_v54 = vmul.f32 %v491_v53, %v18_v52  ;;  %vm26_vm1 = vweird.f32 %v491_v53 }
  0x83   :  { %vm27_vm3 = vmor %vm25_vm2, %vm26_vm1 }
  0x84   :  { %v21_v55 = vmul.f32 %v491_v53, %v20_v54 }
  0x86   :  { %v22_v56 = vmul.f32 0.5, %v21_v55 }
  0x88   :  { %v23_v57 = vsub.f32 1.5, %v22_v56 }
  0x8a   :  { %v24_v58 = vmul.f32 %v491_v53, %v23_v57 }
  0x8c   :  { %v28_v59 = vsel %vm27_vm3, %v491_v53, %v24_v58 }
  0x8d   :  { %v29_v60 = vmul.f32 %v28_v59, %v537_v0 }
  0x8f   :  { %v30_v61 = vpack.c.bf16 %v29_v60, %v29_v60 }
  0x91   :  { %366 = vmatmul.msk.bf16.vlgmr.msra.gmra.mxu0 %vm14_vm0, %v30_v61  ;;  %415 = vmatmul.msk.bf16.vlgmr.msra.gmra.mxu1 %vm14_vm0, %v30_v61 }
  0x92   :  { %464 = vmatmul.msk.bf16.vlgmr.msra.gmra.mxu2 %vm14_vm0, %v30_v61 }
 0x10e   :  { %v123_v62 = vpop.f32.mrf.mxu0  ;;  %v217_v63 = vpop.f32.mrf.mxu1 }
 0x10f   :  { %v221_v1 = vmax.f32 %v123_v62, %v217_v63 }
 0x115   :  { %v312_v2 = vpop.f32.mrf.mxu2 }
 0x116   :  { %v316_v3 = vmax.f32 %v221_v1, %v312_v2  ;;  %v125_v4 = vpop.f32.mrf.mxu0  ;;  %v219_v0 = vpop.f32.mrf.mxu1 }
 0x118   :  { %317 = vst [vmem:[#allocation2] sm:$0xff] %v316_v3 }
 0x119   :  { %328 = dma.vmem_to_hbm [thread:$0]  %s324_s29, 128, %s326_s4, [#allocation3]  }
 0x11d   :  { %v314_v5 = vpop.f32.mrf.mxu2 }
 0x11e   :  { %516 = dma.done.wait [#allocation3], 128  }
 0x11f   :  { %517 = vsyncadd [#allocation3], 4294967168 }
 0x120   :  { %333 = vsyncpa [#allocation3], 1 }

</bundles_post_ra>
